<compile_context>
chip_gen: v7x
topology: tpu7x:2x2x1
jax: 0.10.0
libtpu: 0.0.40
codegen_flags: <defaults>
</compile_context>

<pallas_src>
import math

import jax
import jax.numpy as jnp
from jax.experimental import pallas as pl
from jax.experimental.pallas import tpu as pltpu

HIDDEN_NODES1 = 150
HIDDEN_NODES2 = 120
NEG_SLOPE = 0.01  # F.leaky_relu default

_LANE = 128
_SUBLANE = 8
_DEFAULT_BATCH_TILE = 1024  # bf16 tile: < 3 MiB double-buffered, safe on v5e/v6e/v7x


def _round_up(x, m):
    return ((x + m - 1) // m) * m


def _leaky_relu(x):
    return jnp.where(x >= 0, x, NEG_SLOPE * x)


def _qnet_mlp_kernel(x_ref, w1_ref, b1_ref, w2_ref, b2_ref, w3_ref, b3_ref, o_ref):
    # One batch tile per grid step; weights/biases are VMEM-resident across steps.
    cdt = w1_ref.dtype                      # compute dtype (bf16 default)
    x = x_ref[...].astype(cdt)              # in-VMEM cast, no extra HBM pass
    h1 = _leaky_relu(
        jnp.dot(x, w1_ref[...], preferred_element_type=jnp.float32) + b1_ref[...]
    ).astype(cdt)                           # bias add + activation in f32
    h2 = _leaky_relu(
        jnp.dot(h1, w2_ref[...], preferred_element_type=jnp.float32) + b2_ref[...]
    ).astype(cdt)
    o = jnp.dot(h2, w3_ref[...], preferred_element_type=jnp.float32) + b3_ref[...]
    o_ref[...] = o.astype(o_ref.dtype)


def qnet_mlp_forward(x, params, *, batch_tile=_DEFAULT_BATCH_TILE,
                     out_dtype=jnp.float32, return_padded=False,
                     vmem_limit_bytes=None):
    """x: (batch, num_in) float32 or bfloat16.  params from init_qnet_mlp_params.
    Returns (batch, num_a) Q-values (or the padded (batch, num_a_p) slab if
    return_padded=True, avoiding the post-slice pass)."""
    w1, b1 = params["w1"], params["b1"]
    w2, b2 = params["w2"], params["b2"]
    w3, b3 = params["w3"], params["b3"]
    num_a = params["num_a"]

    batch, num_in = x.shape
    assert num_in == params["num_in"]
    num_a_p = w3.shape[1]

    # Batch tile: multiple of 8 sublanes, never (much) larger than the batch,
    # and capped so large batches produce >= 2 grid steps (v7x megacore).
    tb = min(_round_up(batch_tile, _SUBLANE), _round_up(batch, _SUBLANE))
    if batch > 2 * _SUBLANE:
        tb = min(tb, _round_up(pl.cdiv(batch, 2), _SUBLANE))
    tb = max(tb, _SUBLANE)
    grid = (pl.cdiv(batch, tb),)  # partial tail block handled by Pallas masking

    def _resident(arr):
        # Full-array block, constant index map -> stays in VMEM across grid steps.
        return pl.BlockSpec(arr.shape, lambda i: (0, 0))

    compiler_kwargs = dict(dimension_semantics=("parallel",))  # megacore on v7x
    if vmem_limit_bytes is not None:
        compiler_kwargs["vmem_limit_bytes"] = vmem_limit_bytes

    out = pl.pallas_call(
        _qnet_mlp_kernel,
        out_shape=jax.ShapeDtypeStruct((batch, num_a_p), out_dtype),
        grid=grid,
        in_specs=[
            # x tiles: last dim equals the full (unpadded) num_in -> no pad pass.
            pl.BlockSpec((tb, num_in), lambda i: (i, 0)),
            _resident(w1), _resident(b1),
            _resident(w2), _resident(b2),
            _resident(w3), _resident(b3),
        ],
        out_specs=pl.BlockSpec((tb, num_a_p), lambda i: (i, 0)),
        compiler_params=pltpu.CompilerParams(**compiler_kwargs),
    )(x, w1, b1, w2, b2, w3, b3)

    if return_padded:
        return out
    return out[:, :num_a]


def init_qnet_mlp_params(key, num_in, num_a, compute_dtype=jnp.bfloat16):
    """Deterministic init mirroring the PyTorch module:
       - weights: xavier_uniform_   (stored as (in, out) = PyTorch weight.T)
       - biases:  nn.Linear default U(-1/sqrt(fan_in), 1/sqrt(fan_in))
       Output-feature dims are zero-padded to 128-lane multiples (padding
       provably contributes zero through leaky_relu).  Weights are stored in
       the compute dtype once, at init — no per-forward converts.  w1 keeps
       its logical num_in rows so x never needs padding."""
    keys = jax.random.split(key, 6)
    h1_p = _round_up(HIDDEN_NODES1, _LANE)   # 150 -> 256
    h2_p = _round_up(HIDDEN_NODES2, _LANE)   # 120 -> 128
    num_a_p = _round_up(num_a, _LANE)

    def xavier_uniform(k, fan_in, fan_out, rows, cols_p):
        limit = math.sqrt(6.0 / (fan_in + fan_out))
        # sample in (out, in) like torch then transpose -> (in, out)
        w = jax.random.uniform(k, (fan_out, fan_in), jnp.float32, -limit, limit).T
        wp = jnp.zeros((rows, cols_p), jnp.float32).at[:fan_in, :fan_out].set(w)
        return wp.astype(compute_dtype)

    def linear_bias(k, fan_in, fan_out, cols_p):
        bound = 1.0 / math.sqrt(fan_in)
        b = jax.random.uniform(k, (1, fan_out), jnp.float32, -bound, bound)
        return jnp.zeros((1, cols_p), jnp.float32).at[:, :fan_out].set(b)  # f32

    return {
        "w1": xavier_uniform(keys[0], num_in, HIDDEN_NODES1, num_in, h1_p),
        "b1": linear_bias(keys[1], num_in, HIDDEN_NODES1, h1_p),
        "w2": xavier_uniform(keys[2], HIDDEN_NODES1, HIDDEN_NODES2, h1_p, h2_p),
        "b2": linear_bias(keys[3], HIDDEN_NODES1, HIDDEN_NODES2, h2_p),
        "w3": xavier_uniform(keys[4], HIDDEN_NODES2, num_a, h2_p, num_a_p),
        "b3": linear_bias(keys[5], HIDDEN_NODES2, num_a, num_a_p),
        "num_in": num_in,
        "num_a": num_a,
        "compute_dtype": compute_dtype,
    }


def reference_forward(x, params):
    """Pure-JAX f32 reference using the same (possibly bf16-quantized) weights."""
    num_in, num_a = params["num_in"], params["num_a"]
    w1 = params["w1"][:num_in, :HIDDEN_NODES1].astype(jnp.float32)
    b1 = params["b1"][:, :HIDDEN_NODES1]
    w2 = params["w2"][:HIDDEN_NODES1, :HIDDEN_NODES2].astype(jnp.float32)
    b2 = params["b2"][:, :HIDDEN_NODES2]
    w3 = params["w3"][:HIDDEN_NODES2, :num_a].astype(jnp.float32)
    b3 = params["b3"][:, :num_a]
    h1 = _leaky_relu(x @ w1 + b1)
    h2 = _leaky_relu(h1 @ w2 + b2)
    return h2 @ w3 + b3


if __name__ == "__main__":
    # Small shapes consistent with the module: obs_shape=(4, 16) -> num_in=64, num_a=8
    obs_shape = (4, 16)
    num_in = int(obs_shape[0] * obs_shape[1])
    num_a = 8

    key = jax.random.PRNGKey(0)
    k_params, k_x1, k_x2 = jax.random.split(key, 3)

    # 1) Exact-parity mode (f32 weights / f32 MXU), tiny single-env-step batch.
    params_f32 = init_qnet_mlp_params(k_params, num_in, num_a,
                                      compute_dtype=jnp.float32)
    batch = 2
    obs = jax.random.normal(k_x1, (batch,) + obs_shape, dtype=jnp.float32)
    x = obs.reshape(batch, num_in)  # glue: flatten observation outside the kernel
    out = jax.block_until_ready(qnet_mlp_forward(x, params_f32))
    ref = reference_forward(x, params_f32)
    assert out.shape == (batch, num_a)
    assert jnp.allclose(out, ref, atol=1e-5, rtol=1e-5)

    # 2) Default bf16 MXU path on a replay-buffer batch with a partial tail tile:
    #    batch=300 -> tb=152, grid=2 (no wrapper padding pass, tail rows masked).
    params = init_qnet_mlp_params(k_params, num_in, num_a)  # bf16 weights
    batch2 = 300
    x2 = jax.random.normal(k_x2, (batch2, num_in), dtype=jnp.float32)
    out2 = jax.block_until_ready(qnet_mlp_forward(x2, params))
    ref2 = reference_forward(x2, params)
    assert out2.shape == (batch2, num_a)
    assert jnp.allclose(out2, ref2, atol=5e-2, rtol=5e-2)

    # 3) bf16 output + padded slab consumption (halved writeback, no post-slice).
    out3 = jax.block_until_ready(
        qnet_mlp_forward(x2, params, out_dtype=jnp.bfloat16, return_padded=True))
    assert out3.shape == (batch2, 128)
    assert jnp.allclose(out3[:, :num_a].astype(jnp.float32), ref2,
                        atol=1e-1, rtol=1e-1)
    assert jnp.all(out3[:, num_a:] == 0)  # padded lanes are exact zeros

    print("KERNEL_OK")
</pallas_src>

<mosaic_0001>
module attributes {stable_mosaic.version = 11 : i64} {
  func.func @_qnet_mlp_kernel(%arg0: i32, %arg1: memref<8x64xf32, #tpu.memory_space<vmem>>, %arg2: memref<64x256xf32, #tpu.memory_space<vmem>>, %arg3: memref<1x256xf32, #tpu.memory_space<vmem>>, %arg4: memref<256x128xf32, #tpu.memory_space<vmem>>, %arg5: memref<1x128xf32, #tpu.memory_space<vmem>>, %arg6: memref<128x128xf32, #tpu.memory_space<vmem>>, %arg7: memref<1x128xf32, #tpu.memory_space<vmem>>, %arg8: memref<8x128xf32, #tpu.memory_space<vmem>>) attributes {dimension_semantics = [#tpu.dimension_semantics<parallel>], iteration_bounds = array<i64: 1>, scalar_prefetch = 0 : i64, scratch_operands = 0 : i64, tpu.core_type = #tpu.core_type<tc>, window_params = [{transform_indices = @transform_0, window_bounds = array<i64: 8, 64>}, {pipeline_mode = #tpu.pipeline_mode<synchronous>, transform_indices = @transform_1, window_bounds = array<i64: 64, 256>}, {pipeline_mode = #tpu.pipeline_mode<synchronous>, transform_indices = @transform_2, window_bounds = array<i64: 1, 256>}, {pipeline_mode = #tpu.pipeline_mode<synchronous>, transform_indices = @transform_3, window_bounds = array<i64: 256, 128>}, {pipeline_mode = #tpu.pipeline_mode<synchronous>, transform_indices = @transform_4, window_bounds = array<i64: 1, 128>}, {pipeline_mode = #tpu.pipeline_mode<synchronous>, transform_indices = @transform_5, window_bounds = array<i64: 128, 128>}, {pipeline_mode = #tpu.pipeline_mode<synchronous>, transform_indices = @transform_6, window_bounds = array<i64: 1, 128>}, {transform_indices = @transform_7, window_bounds = array<i64: 8, 128>}]} {
    %c0 = arith.constant 0 : index
    %c0_0 = arith.constant 0 : index
    %0 = vector.load %arg1[%c0, %c0_0] : memref<8x64xf32, #tpu.memory_space<vmem>>, vector<8x64xf32>
    %c0_1 = arith.constant 0 : index
    %c0_2 = arith.constant 0 : index
    %1 = vector.load %arg2[%c0_1, %c0_2] : memref<64x256xf32, #tpu.memory_space<vmem>>, vector<64x256xf32>
    %cst = arith.constant dense<0.000000e+00> : vector<8x256xf32>
    %2 = tpu.matmul %0, %1, %cst {dimension_numbers = #tpu.dot_dimension_numbers<[1], [0], [0], [1], [0, 0, 1, 1], [], []>} : vector<8x64xf32>, vector<64x256xf32>, vector<8x256xf32> -> vector<8x256xf32>
    %c0_3 = arith.constant 0 : index
    %c0_4 = arith.constant 0 : index
    %3 = vector.load %arg3[%c0_3, %c0_4] : memref<1x256xf32, #tpu.memory_space<vmem>>, vector<1x256xf32>
    %4 = vector.broadcast %3 : vector<1x256xf32> to vector<8x256xf32>
    %5 = arith.addf %2, %4 : vector<8x256xf32>
    %cst_5 = arith.constant 0.000000e+00 : f32
    %6 = vector.broadcast %cst_5 : f32 to vector<8x256xf32>
    %7 = arith.cmpf oge, %5, %6 : vector<8x256xf32>
    %cst_6 = arith.constant 0.00999999977 : f32
    %8 = vector.broadcast %cst_6 : f32 to vector<8x256xf32>
    %9 = arith.mulf %8, %5 : vector<8x256xf32>
    %10 = arith.select %7, %5, %9 : vector<8x256xi1>, vector<8x256xf32>
    %c0_7 = arith.constant 0 : index
    %c0_8 = arith.constant 0 : index
    %11 = vector.load %arg4[%c0_7, %c0_8] : memref<256x128xf32, #tpu.memory_space<vmem>>, vector<256x128xf32>
    %cst_9 = arith.constant dense<0.000000e+00> : vector<8x128xf32>
    %12 = tpu.matmul %10, %11, %cst_9 {dimension_numbers = #tpu.dot_dimension_numbers<[1], [0], [0], [1], [0, 0, 1, 1], [], []>} : vector<8x256xf32>, vector<256x128xf32>, vector<8x128xf32> -> vector<8x128xf32>
    %c0_10 = arith.constant 0 : index
    %c0_11 = arith.constant 0 : index
    %13 = vector.load %arg5[%c0_10, %c0_11] : memref<1x128xf32, #tpu.memory_space<vmem>>, vector<1x128xf32>
    %14 = vector.broadcast %13 : vector<1x128xf32> to vector<8x128xf32>
    %15 = arith.addf %12, %14 : vector<8x128xf32>
    %cst_12 = arith.constant 0.000000e+00 : f32
    %16 = vector.broadcast %cst_12 : f32 to vector<8x128xf32>
    %17 = arith.cmpf oge, %15, %16 : vector<8x128xf32>
    %cst_13 = arith.constant 0.00999999977 : f32
    %18 = vector.broadcast %cst_13 : f32 to vector<8x128xf32>
    %19 = arith.mulf %18, %15 : vector<8x128xf32>
    %20 = arith.select %17, %15, %19 : vector<8x128xi1>, vector<8x128xf32>
    %c0_14 = arith.constant 0 : index
    %c0_15 = arith.constant 0 : index
    %21 = vector.load %arg6[%c0_14, %c0_15] : memref<128x128xf32, #tpu.memory_space<vmem>>, vector<128x128xf32>
    %cst_16 = arith.constant dense<0.000000e+00> : vector<8x128xf32>
    %22 = tpu.matmul %20, %21, %cst_16 {dimension_numbers = #tpu.dot_dimension_numbers<[1], [0], [0], [1], [0, 0, 1, 1], [], []>} : vector<8x128xf32>, vector<128x128xf32>, vector<8x128xf32> -> vector<8x128xf32>
    %c0_17 = arith.constant 0 : index
    %c0_18 = arith.constant 0 : index
    %23 = vector.load %arg7[%c0_17, %c0_18] : memref<1x128xf32, #tpu.memory_space<vmem>>, vector<1x128xf32>
    %24 = vector.broadcast %23 : vector<1x128xf32> to vector<8x128xf32>
    %25 = arith.addf %22, %24 : vector<8x128xf32>
    %c0_19 = arith.constant 0 : index
    %c0_20 = arith.constant 0 : index
    %26 = vector.load %arg8[%c0_19, %c0_20] : memref<8x128xf32, #tpu.memory_space<vmem>>, vector<8x128xf32>
    tpu.vector_store %arg8[%c0_19, %c0_20], %25 {strides = array<i32>} : memref<8x128xf32, #tpu.memory_space<vmem>>, vector<8x128xf32>,
    return
  }
  func.func @transform_0(%arg0: i32) -> (i32, i32) {
    %c0_i32 = arith.constant 0 : i32
    %c0_i32_0 = arith.constant 0 : i32
    return %arg0, %c0_i32 : i32, i32
  }
  func.func @transform_1(%arg0: i32) -> (i32, i32) {
    %c0_i32 = arith.constant 0 : i32
    %c0_i32_0 = arith.constant 0 : i32
    %c0_i32_1 = arith.constant 0 : i32
    return %c0_i32, %c0_i32_0 : i32, i32
  }
  func.func @transform_2(%arg0: i32) -> (i32, i32) {
    %c0_i32 = arith.constant 0 : i32
    %c0_i32_0 = arith.constant 0 : i32
    %c0_i32_1 = arith.constant 0 : i32
    return %c0_i32, %c0_i32_0 : i32, i32
  }
  func.func @transform_3(%arg0: i32) -> (i32, i32) {
    %c0_i32 = arith.constant 0 : i32
    %c0_i32_0 = arith.constant 0 : i32
    %c0_i32_1 = arith.constant 0 : i32
    return %c0_i32, %c0_i32_0 : i32, i32
  }
  func.func @transform_4(%arg0: i32) -> (i32, i32) {
    %c0_i32 = arith.constant 0 : i32
    %c0_i32_0 = arith.constant 0 : i32
    %c0_i32_1 = arith.constant 0 : i32
    return %c0_i32, %c0_i32_0 : i32, i32
  }
  func.func @transform_5(%arg0: i32) -> (i32, i32) {
    %c0_i32 = arith.constant 0 : i32
    %c0_i32_0 = arith.constant 0 : i32
    %c0_i32_1 = arith.constant 0 : i32
    return %c0_i32, %c0_i32_0 : i32, i32
  }
  func.func @transform_6(%arg0: i32) -> (i32, i32) {
    %c0_i32 = arith.constant 0 : i32
    %c0_i32_0 = arith.constant 0 : i32
    %c0_i32_1 = arith.constant 0 : i32
    return %c0_i32, %c0_i32_0 : i32, i32
  }
  func.func @transform_7(%arg0: i32) -> (i32, i32) {
    %c0_i32 = arith.constant 0 : i32
    %c0_i32_0 = arith.constant 0 : i32
    return %arg0, %c0_i32 : i32, i32
  }
}

</mosaic_0001>

<bundles_post_ra>
// kernel: tpu_custom_call.1
= control target key start
LH: loop header
LB: loop body
LE: loop exit
PB: predicated region body
PF: predicated region fallthrough
CT: control target
= control target key end

     0   :  { %12 = vsyncpa [#allocation3], 0  ;;  %s842_s0 = inlined_call_operand.hbm [shape: f32[2,64], index: 0, kind: input, shape index: {}]   ;;  %s843_s1 = inlined_call_operand.hbm [shape: f32[64,256], index: 1, kind: input, shape index: {}]   ;;  %s844_s2 = inlined_call_operand.vmem [shape: f32[1,256], index: 2, kind: input, shape index: {}]   ;;  %s845_s3 = inlined_call_operand.hbm [shape: f32[256,128], index: 3, kind: input, shape index: {}]   ;;  %s846_s4 = inlined_call_operand.vmem [shape: f32[1,128], index: 4, kind: input, shape index: {}]   ;;  %s847_s5 = inlined_call_operand.hbm [shape: f32[128,128], index: 5, kind: input, shape index: {}]   ;;  %s848_s6 = inlined_call_operand.vmem [shape: f32[1,128], index: 6, kind: input, shape index: {}]   ;;  %s849_s7 = inlined_call_operand.hbm [shape: f32[2,128], index: 7, kind: output, shape index: {}]  }
   0x1   :  { %13 = vsyncpa [#allocation6], 0 }
   0x2   :  { %14 = vsyncpa [#allocation9], 0 }
   0x3   :  { %15 = vsyncpa [#allocation4], 0 }
   0x4   :  { %20 = vsyncadd [#allocation3], 96  ;;  %s711_s24 = smov [#allocation5]   ;;  %s593_s28 = scalar_lea.hbm %s843_s1, 2048 }
   0x5   :  { %s33_s25 = sshll.u32 %s711_s24, 4  ;;  %p594_p0 = scmp.ne.s32.totalorder %s843_s1, %s593_s28  ;;  %s34_s25 = int_to_ptr.vmem [resolvable:$true] %s33_s25 }
   0x6   :  { %p597_p1 = scmp.lt.u32.totalorder %s593_s28, %s843_s1 }
   0x8   :  { %p599_p2 = pnand %p597_p1, %p594_p0 }
   0xa   :  { %602 = shalt.err (!%p599_p2)
}
   0xb   :  { %s603_s10 = scalar_lea.vmem %s34_s25, 2048  ;;  %p608_p4 = scmp.lt.s32.totalorder %s34_s25, %s34_s25 }
   0xc   :  { %p604_p3 = scmp.ne.s32.totalorder %s34_s25, %s603_s10  ;;  %p609_p5 = scmp.lt.s32.totalorder %s603_s10, %s603_s10 }
   0xe   :  { %p610_p6 = por %p609_p5, %p608_p4 }
  0x10   :  { %p611_p7 = pnand %p610_p6, %p604_p3 }
  0x12   :  { %614 = shalt.err (!%p611_p7)
}
  0x13   :  { %s712_s11 = smov 256   ;;  %s713_s12 = smov 16  }
  0x14   :  { %39 = dma.hbm_to_vmem [thread:$0]  %s843_s1, 2048, %s34_s25, [#allocation6], %s712_s11, %s712_s11, %s713_s12  }
  0x15   :  { %s714_s15 = smov [#allocation2]   ;;  %s615_s19 = scalar_lea.hbm %s842_s0, 32 }
  0x16   :  { %s21_s16 = sshll.u32 %s714_s15, 4  ;;  %p616_p8 = scmp.ne.s32.totalorder %s842_s0, %s615_s19  ;;  %s22_s16 = int_to_ptr.vmem [resolvable:$true] %s21_s16 }
  0x17   :  { %p619_p9 = scmp.lt.u32.totalorder %s615_s19, %s842_s0 }
  0x19   :  { %p621_p10 = pnand %p619_p9, %p616_p8 }
  0x1b   :  { %624 = shalt.err (!%p621_p10)
}
  0x1c   :  { %s625_s24 = scalar_lea.vmem %s22_s16, 32  ;;  %s629_s1 = scalar_lea.vmem %s22_s16, 128 }
  0x1d   :  { %p626_p11 = scmp.ne.s32.totalorder %s22_s16, %s625_s24  ;;  %p630_p12 = scmp.lt.s32.totalorder %s22_s16, %s22_s16 }
  0x1e   :  { %p631_p13 = scmp.lt.s32.totalorder %s629_s1, %s625_s24 }
  0x20   :  { %p632_p0 = por %p631_p13, %p630_p12 }
  0x22   :  { %p633_p1 = pnand %p632_p0, %p626_p11 }
  0x24   :  { %636 = shalt.err (!%p633_p1)
}
  0x25   :  { %s715_s25 = smov 32   ;;  %s716_s26 = smov 2  }
  0x26   :  { %27 = dma.hbm_to_vmem [thread:$0]  %s842_s0, 32, %s22_s16, [#allocation3], %s715_s25, %s715_s25, %s716_s26  }
  0x27   :  { %s717_s29 = smov [#allocation7]   ;;  %s637_s10 = scalar_lea.hbm %s845_s3, 4096 }
  0x28   :  { %s47_s30 = sshll.u32 %s717_s29, 4  ;;  %p638_p2 = scmp.ne.s32.totalorder %s845_s3, %s637_s10  ;;  %s48_s30 = int_to_ptr.vmem [resolvable:$true] %s47_s30 }
  0x29   :  { %p641_p3 = scmp.lt.u32.totalorder %s637_s10, %s845_s3 }
  0x2b   :  { %p643_p4 = pnand %p641_p3, %p638_p2 }
  0x2d   :  { %646 = shalt.err (!%p643_p4)
}
  0x2e   :  { %s647_s15 = scalar_lea.vmem %s48_s30, 4096  ;;  %p652_p6 = scmp.lt.s32.totalorder %s48_s30, %s48_s30 }
  0x2f   :  { %p648_p5 = scmp.ne.s32.totalorder %s48_s30, %s647_s15  ;;  %p653_p7 = scmp.lt.s32.totalorder %s647_s15, %s647_s15 }
  0x31   :  { %p654_p8 = por %p653_p7, %p652_p6 }
  0x33   :  { %p655_p9 = pnand %p654_p8, %p648_p5 }
  0x35   :  { %658 = shalt.err (!%p655_p9)
}
  0x36   :  { %s718_s0 = smov 128   ;;  %s719_s16 = smov 8  }
  0x37   :  { %53 = dma.hbm_to_vmem [thread:$0]  %s845_s3, 4096, %s48_s30, [#allocation6], %s718_s0, %s718_s0, %s719_s16  }
  0x38   :  { %s720_s19 = smov [#allocation8]   ;;  %s659_s23 = scalar_lea.hbm %s847_s5, 2048 }
  0x39   :  { %s61_s20 = sshll.u32 %s720_s19, 4  ;;  %p660_p10 = scmp.ne.s32.totalorder %s847_s5, %s659_s23  ;;  %s62_s20 = int_to_ptr.vmem [resolvable:$true] %s61_s20 }
  0x3a   :  { %p663_p11 = scmp.lt.u32.totalorder %s659_s23, %s847_s5 }
  0x3c   :  { %p665_p12 = pnand %p663_p11, %p660_p10 }
  0x3e   :  { %668 = shalt.err (!%p665_p12)
}
  0x3f   :  { %s669_s29 = scalar_lea.vmem %s62_s20, 2048  ;;  %p674_p0 = scmp.lt.s32.totalorder %s62_s20, %s62_s20 }
  0x40   :  { %p670_p13 = scmp.ne.s32.totalorder %s62_s20, %s669_s29  ;;  %p675_p1 = scmp.lt.s32.totalorder %s669_s29, %s669_s29 }
  0x42   :  { %p676_p2 = por %p675_p1, %p674_p0 }
  0x44   :  { %p677_p3 = pnand %p676_p2, %p670_p13 }
  0x46   :  { %680 = shalt.err (!%p677_p3)
}
  0x47   :  { %67 = dma.hbm_to_vmem [thread:$0]  %s847_s5, 2048, %s62_s20, [#allocation9], %s718_s0, %s718_s0, %s719_s16  }
  0x48   :  { %703 = dma.done.wait [#allocation3], 128  }
  0x49   :  { %704 = vsyncadd [#allocation3], 4294967168 }
  0x4a   :  { %705 = dma.done.wait [#allocation6], 6144  }
  0x4b   :  { %706 = vsyncadd [#allocation6], 4294961152 }
  0x4c   :  { %707 = dma.done.wait [#allocation9], 2048  }
  0x4d   :  { %708 = vsyncadd [#allocation9], 4294965248  ;;  %v721_v0 = vmov 0.0   ;;  %v84_v1 = vld [vmem:[#allocation5 + $0x8] sm:$0xff]  ;;  %v86_v2 = vld [vmem:[#allocation5 + $0x18] sm:$0xff]  ;;  %vm111_vm0 = vcmask 523264  }
  0x4e   :  { %179 = vmatprep.mubr.f32.mxu0 %v721_v0  ;;  %v83_v3 = vld [vmem:[#allocation5] sm:$0xff]  ;;  %v507_v4 = vpack.c.bf16 %v86_v2, %v84_v1  ;;  %v85_v5 = vld [vmem:[#allocation5 + $0x10] sm:$0xff]  ;;  %v88_v6 = vld [vmem:[#allocation5 + $0x28] sm:$0xff]  ;;  %vm723_vm3 = vmmov 0  }
  0x4f   :  { %v90_v7 = vld [vmem:[#allocation5 + $0x38] sm:$0xff]  ;;  %v509_v8 = vpack.c.bf16 %v85_v5, %v83_v3  ;;  %v87_v10 = vld [vmem:[#allocation5 + $0x20] sm:$0xff]  ;;  %v89_v11 = vld [vmem:[#allocation5 + $0x30] sm:$0xff] }
  0x50   :  { %v511_v9 = vpack.c.bf16 %v90_v7, %v88_v6  ;;  %v92_v12 = vld [vmem:[#allocation5 + $0x48] sm:$0xff]  ;;  %508 = vmatprep.subr.bf16.mxu0 %v507_v4  ;;  %v94_v13 = vld [vmem:[#allocation5 + $0x58] sm:$0xff]  ;;  %v513_v14 = vpack.c.bf16 %v89_v11, %v87_v10  ;;  %v91_v15 = vld [vmem:[#allocation5 + $0x40] sm:$0xff] }
  0x51   :  { %510 = vmatpush1.bf16.msra.mxu0 %v509_v8  ;;  %v93_v16 = vld [vmem:[#allocation5 + $0x50] sm:$0xff]  ;;  %v515_v17 = vpack.c.bf16 %v94_v13, %v92_v12  ;;  %v96_v18 = vld [vmem:[#allocation5 + $0x68] sm:$0xff]  ;;  %v98_v19 = vld [vmem:[#allocation5 + $0x78] sm:$0xff] }
  0x52   :  { %512 = vmatprep.subr.bf16.mxu0 %v511_v9  ;;  %v208_v20 = vld [vmem:[#allocation7 + $0x80] sm:$0xff]  ;;  %v209_v21 = vld [vmem:[#allocation7 + $0x88] sm:$0xff]  ;;  %v210_v26 = vld [vmem:[#allocation7 + $0x90] sm:$0xff]  ;;  %v517_v29 = vpack.c.bf16 %v93_v16, %v91_v15  ;;  %v519_v34 = vpack.c.bf16 %v98_v19, %v96_v18 }
  0x53   :  { %v192_v22 = vld [vmem:[#allocation7] sm:$0xff]  ;;  %v193_v23 = vld [vmem:[#allocation7 + $0x8] sm:$0xff]  ;;  %v523_v24 = vpack.c.bf16 %v209_v21, %v208_v20  ;;  %v211_v27 = vld [vmem:[#allocation7 + $0x98] sm:$0xff] }
  0x54   :  { %v525_v25 = vpack.c.bf16 %v193_v23, %v192_v22  ;;  %v194_v28 = vld [vmem:[#allocation7 + $0x10] sm:$0xff]  ;;  %v527_v30 = vpack.c.bf16 %v211_v27, %v210_v26  ;;  %v195_v31 = vld [vmem:[#allocation7 + $0x18] sm:$0xff]  ;;  %v212_v32 = vld [vmem:[#allocation7 + $0xa0] sm:$0xff] }
  0x55   :  { %514 = vmatpush1.bf16.msra.mxu0 %v513_v14  ;;  %v213_v33 = vld [vmem:[#allocation7 + $0xa8] sm:$0xff]  ;;  %v95_v35 = vld [vmem:[#allocation5 + $0x60] sm:$0xff]  ;;  %v97_v36 = vld [vmem:[#allocation5 + $0x70] sm:$0xff]  ;;  %524 = vmatprep.subr.bf16.mxu1 %v523_v24  ;;  %v529_v37 = vpack.c.bf16 %v195_v31, %v194_v28  ;;  %v722_v14 = vmov 0.0|0.0  }
  0x56   :  { %516 = vmatprep.subr.bf16.mxu0 %v515_v17  ;;  %526 = vmatpush3.bf16.msra.mxu1 %v525_v25  ;;  %v531_v38 = vpack.c.bf16 %v213_v33, %v212_v32  ;;  %v196_v39 = vld [vmem:[#allocation7 + $0x20] sm:$0xff]  ;;  %v197_v40 = vld [vmem:[#allocation7 + $0x28] sm:$0xff]  ;;  %v521_v41 = vpack.c.bf16 %v97_v36, %v95_v35  ;;  %v214_v42 = vld [vmem:[#allocation7 + $0xb0] sm:$0xff] }
  0x57   :  { %528 = vmatprep.subr.bf16.mxu1 %v527_v30  ;;  %v215_v43 = vld [vmem:[#allocation7 + $0xb8] sm:$0xff]  ;;  %v533_v44 = vpack.c.bf16 %v197_v40, %v196_v39  ;;  %v198_v46 = vld [vmem:[#allocation7 + $0x30] sm:$0xff]  ;;  %v216_v49 = vld [vmem:[#allocation7 + $0xc0] sm:$0xff]  ;;  %v101_v30 = vlaneseq }
  0x58   :  { %v535_v45 = vpack.c.bf16 %v215_v43, %v214_v42  ;;  %v199_v47 = vld [vmem:[#allocation7 + $0x38] sm:$0xff]  ;;  %v217_v50 = vld [vmem:[#allocation7 + $0xc8] sm:$0xff]  ;;  %v200_v53 = vld [vmem:[#allocation7 + $0x40] sm:$0xff] }
  0x59   :  { %518 = vmatpush1.bf16.msra.mxu0 %v517_v29  ;;  %v82_v48 = vld [vmem:[#allocation2] sm:$0xff]  ;;  %v537_v51 = vpack.c.bf16 %v199_v47, %v198_v46  ;;  %v539_v52 = vpack.c.bf16 %v217_v50, %v216_v49  ;;  %v201_v54 = vld [vmem:[#allocation7 + $0x48] sm:$0xff]  ;;  %v218_v55 = vld [vmem:[#allocation7 + $0xd0] sm:$0xff]  ;;  %v102_v31 = vshrl.u32 %v101_v30, 7 }
  0x5a   :  { %520 = vmatprep.subr.bf16.mxu0 %v519_v34  ;;  %530 = vmatpush3.bf16.msra.mxu1 %v529_v37  ;;  %v219_v56 = vld [vmem:[#allocation7 + $0xd8] sm:$0xff]  ;;  %v541_v57 = vpack.c.bf16 %v201_v54, %v200_v53  ;;  %v202_v59 = vld [vmem:[#allocation7 + $0x50] sm:$0xff]  ;;  %v220_v62 = vld [vmem:[#allocation7 + $0xe0] sm:$0xff] }
  0x5b   :  { %532 = vmatprep.subr.bf16.mxu1 %v531_v38  ;;  %v543_v58 = vpack.c.bf16 %v219_v56, %v218_v55  ;;  %v203_v60 = vld [vmem:[#allocation7 + $0x58] sm:$0xff]  ;;  %v221_v63 = vld [vmem:[#allocation7 + $0xe8] sm:$0xff]  ;;  %v204_v2 = vld [vmem:[#allocation7 + $0x60] sm:$0xff]  ;;  %v103_v32 = vsub.s32 0, %v102_v31  ;;  %v107_v34 = vsub.s32 1, %v102_v31 }
  0x5c   :  { %v545_v61 = vpack.c.bf16 %v203_v60, %v202_v59  ;;  %v547_v1 = vpack.c.bf16 %v221_v63, %v220_v62  ;;  %v205_v3 = vld [vmem:[#allocation7 + $0x68] sm:$0xff]  ;;  %v222_v5 = vld [vmem:[#allocation7 + $0xf0] sm:$0xff]  ;;  %v223_v6 = vld [vmem:[#allocation7 + $0xf8] sm:$0xff] }
  0x5d   :  { %522 = vmatpush1.bf16.msra.mxu0 %v521_v41  ;;  %v549_v4 = vpack.c.bf16 %v205_v3, %v204_v2  ;;  %v551_v7 = vpack.c.bf16 %v223_v6, %v222_v5  ;;  %v206_v8 = vld [vmem:[#allocation7 + $0x70] sm:$0xff]  ;;  %v207_v9 = vld [vmem:[#allocation7 + $0x78] sm:$0xff]  ;;  %v304_v11 = vld [vmem:[#allocation8] sm:$0xff] }
  0x5e   :  { %534 = vmatpush3.bf16.msra.mxu1 %v533_v44  ;;  %v553_v10 = vpack.c.bf16 %v207_v9, %v206_v8  ;;  %v305_v12 = vld [vmem:[#allocation8 + $0x8] sm:$0xff]  ;;  %v306_v13 = vld [vmem:[#allocation8 + $0x10] sm:$0xff]  ;;  %555 = vmatprep.subr.bf16.mxu0 %v722_v14  ;;  %v307_v16 = vld [vmem:[#allocation8 + $0x18] sm:$0xff] }
  0x5f   :  { %536 = vmatprep.subr.bf16.mxu1 %v535_v45  ;;  %v556_v15 = vpack.c.bf16 %v305_v12, %v304_v11  ;;  %v559_v17 = vpack.c.bf16 %v307_v16, %v306_v13  ;;  %v308_v18 = vld [vmem:[#allocation8 + $0x20] sm:$0xff]  ;;  %v309_v19 = vld [vmem:[#allocation8 + $0x28] sm:$0xff]  ;;  %v310_v21 = vld [vmem:[#allocation8 + $0x30] sm:$0xff] }
  0x60   :  { %417 = vmatmul.mubr.msk.f32.vlgmr.msra.gmra.mrb[0].mxu0 %vm111_vm0, %v82_v48  ;;  %v562_v20 = vpack.c.bf16 %v309_v19, %v308_v18  ;;  %v311_v22 = vld [vmem:[#allocation8 + $0x38] sm:$0xff]  ;;  %v312_v24 = vld [vmem:[#allocation8 + $0x40] sm:$0xff]  ;;  %v313_v25 = vld [vmem:[#allocation8 + $0x48] sm:$0xff] }
  0x61   :  { %557 = vmatpush3.bf16.msra.mxu0 %v556_v15  ;;  %v565_v23 = vpack.c.bf16 %v311_v22, %v310_v21  ;;  %v568_v26 = vpack.c.bf16 %v313_v25, %v312_v24  ;;  %v314_v27 = vld [vmem:[#allocation8 + $0x50] sm:$0xff]  ;;  %v315_v28 = vld [vmem:[#allocation8 + $0x58] sm:$0xff]  ;;  %v316_v45 = vld [vmem:[#allocation8 + $0x60] sm:$0xff]  ;;  %504 = vmatprep.mubr.msk.f32.mxu0 %vm723_vm3, %v721_v0 }
  0x62   :  { %538 = vmatpush3.bf16.msra.mxu1 %v537_v51  ;;  %558 = vmatprep.subr.bf16.mxu0 %v722_v14  ;;  %v571_v29 = vpack.c.bf16 %v315_v28, %v314_v27  ;;  %v99_v33 = vld [vmem:[%s844_s2] sm:$0x3]  ;;  %v317_v46 = vld [vmem:[#allocation8 + $0x68] sm:$0xff]  ;;  %v318_v48 = vld [vmem:[#allocation8 + $0x70] sm:$0xff] }
  0x63   :  { %540 = vmatprep.subr.bf16.mxu1 %v539_v52  ;;  %v104_v35 = vrot.slane %v99_v33, %v103_v32  ;;  %v108_v36 = vrot.slane %v99_v33, %v107_v34  ;;  %v574_v47 = vpack.c.bf16 %v317_v46, %v316_v45  ;;  %v319_v49 = vld [vmem:[#allocation8 + $0x78] sm:$0xff] }
  0x64   :  { %v577_v50 = vpack.c.bf16 %v319_v49, %v318_v48  ;;  %v418_v52 = vld [vmem:[%s846_s4] ss:$0 sm:$0xff] }
  0x65   :  { %560 = vmatpush3.bf16.msra.mxu0 %v559_v17 }
  0x66   :  { %542 = vmatpush3.bf16.msra.mxu1 %v541_v57  ;;  %561 = vmatprep.subr.bf16.mxu0 %v722_v14 }
  0x67   :  { %544 = vmatprep.subr.bf16.mxu1 %v543_v58  ;;  %v419_v58 = vld [vmem:[%s848_s6] ss:$0 sm:$0xff] }
  0x69   :  { %563 = vmatpush3.bf16.msra.mxu0 %v562_v20 }
  0x6a   :  { %546 = vmatpush3.bf16.msra.mxu1 %v545_v61  ;;  %564 = vmatprep.subr.bf16.mxu0 %v722_v14 }
  0x6b   :  { %548 = vmatprep.subr.bf16.mxu1 %v547_v1 }
  0x6d   :  { %566 = vmatpush3.bf16.msra.mxu0 %v565_v23 }
  0x6e   :  { %550 = vmatpush3.bf16.msra.mxu1 %v549_v4  ;;  %567 = vmatprep.subr.bf16.mxu0 %v722_v14 }
  0x6f   :  { %552 = vmatprep.subr.bf16.mxu1 %v551_v7 }
  0x71   :  { %569 = vmatpush3.bf16.msra.mxu0 %v568_v26 }
  0x72   :  { %554 = vmatpush3.bf16.msra.mxu1 %v553_v10  ;;  %570 = vmatprep.subr.bf16.mxu0 %v722_v14 }
  0x75   :  { %572 = vmatpush3.bf16.msra.mxu0 %v571_v29 }
  0x76   :  { %573 = vmatprep.subr.bf16.mxu0 %v722_v14 }
  0x79   :  { %575 = vmatpush3.bf16.msra.mxu0 %v574_v47 }
  0x7a   :  { %576 = vmatprep.subr.bf16.mxu0 %v722_v14 }
  0x7d   :  { %578 = vmatpush3.bf16.msra.mxu0 %v577_v50 }
 0x133   :  { %v181_v37 = vpop.f32.mrb[0].mxu0 }
 0x134   :  { %v182_v38 = vadd.f32 %v181_v37, %v104_v35  ;;  %v183_v39 = vpop.f32.mrb[1].mxu0 }
 0x135   :  { %v184_v40 = vadd.f32 %v183_v39, %v108_v36 }
 0x136   :  { %v188_v41 = vmul.f32 0.01, %v182_v38  ;;  %vm186_vm2 = vcmp.ge.f32.partialorder %v182_v38, 0.0 }
 0x137   :  { %vm187_vm1 = vcmp.ge.f32.partialorder %v184_v40, 0.0  ;;  %v189_v42 = vmul.f32 0.01, %v184_v40 }
 0x138   :  { %v190_v44 = vsel %vm186_vm2, %v182_v38, %v188_v41 }
 0x139   :  { %v191_v43 = vsel %vm187_vm1, %v184_v40, %v189_v42 }
 0x13a   :  { %295 = vmatprep.mubr.f32.mxu1 %v191_v43 }
 0x13b   :  { %296 = vmatmul.mubr.f32.vlgmr.msra.gmra.mrb[0].mxu1 %v190_v44 }
 0x20e   :  { %v452_v51 = vpop.f32.mrb[0].mxu1 }
 0x20f   :  { %v453_v53 = vpop.f32.mrb[1].mxu1 }
 0x210   :  { %v454_v54 = vadd.f32 %v453_v53, %v452_v51 }
 0x212   :  { %v298_v55 = vadd.f32 %v454_v54, %v418_v52 }
 0x214   :  { %v302_v56 = vmul.f32 0.01, %v298_v55  ;;  %vm301_vm4 = vcmp.ge.f32.partialorder %v298_v55, 0.0 }
 0x216   :  { %v303_v57 = vsel %vm301_vm4, %v298_v55, %v302_v56 }
 0x217   :  { %505 = vmatmul.mubr.f32.vlgmr.msra.gmra.mrb[2].mxu0 %v303_v57 }
 0x2ea   :  { %v393_v59 = vpop.f32.mrb[2].mxu0 }
 0x2eb   :  { %v394_v60 = vadd.f32 %v419_v58, %v393_v59  ;;  %v506_v61 = vpop.f32.mrb[3].mxu0 }
 0x2ed   :  { %397 = vst [vmem:[#allocation10] sm:$0xff] %v394_v60 }
 0x2ee   :  { %402 = vsyncadd [#allocation4], 96  ;;  %s724_s12 = smov [#allocation10]  }
 0x2ef   :  { %s403_s13 = sshll.u32 %s724_s12, 4  ;;  %s404_s13 = int_to_ptr.vmem [resolvable:$true] %s403_s13 }
 0x2f0   :  { %s681_s4 = scalar_lea.vmem %s404_s13, 32  ;;  %s685_s14 = scalar_lea.vmem %s404_s13, 128 }
 0x2f1   :  { %p682_p4 = scmp.ne.s32.totalorder %s404_s13, %s681_s4  ;;  %p686_p5 = scmp.lt.s32.totalorder %s404_s13, %s404_s13 }
 0x2f2   :  { %p687_p6 = scmp.lt.s32.totalorder %s685_s14, %s681_s4 }
 0x2f4   :  { %p688_p7 = por %p687_p6, %p686_p5 }
 0x2f6   :  { %p689_p8 = pnand %p688_p7, %p682_p4 }
 0x2f8   :  { %692 = shalt.err (!%p689_p8)
}
 0x2f9   :  { %s693_s6 = scalar_lea.hbm %s849_s7, 32 }
 0x2fa   :  { %p694_p9 = scmp.ne.s32.totalorder %s849_s7, %s693_s6  ;;  %p697_p10 = scmp.lt.u32.totalorder %s693_s6, %s849_s7 }
 0x2fc   :  { %p699_p11 = pnand %p697_p10, %p694_p9 }
 0x2fe   :  { %702 = shalt.err (!%p699_p11)
}
 0x2ff   :  { %409 = dma.vmem_to_hbm [thread:$0]  %s404_s13, 32, %s849_s7, [#allocation4], %s715_s25, %s715_s25, %s716_s26  }
 0x300   :  { %709 = dma.done.wait [#allocation4], 128  }
 0x301   :  { %710 = vsyncadd [#allocation4], 4294967168 }
 0x302   :  { %413 = vsyncpa [#allocation3], 1 }
 0x303   :  { %414 = vsyncpa [#allocation6], 1 }
 0x304   :  { %415 = vsyncpa [#allocation9], 1 }
 0x305   :  { %416 = vsyncpa [#allocation4], 1 }

</bundles_post_ra>
